<compile_context>
chip_gen: v7x
topology: tpu7x:2x2x1
jax: 0.10.0
libtpu: 0.0.40
codegen_flags: <defaults>
</compile_context>

<pallas_src>
import functools

import jax
import jax.numpy as jnp
from jax.experimental import pallas as pl
from jax.experimental.pallas import tpu as pltpu


def _round_up(n, m):
    return ((n + m - 1) // m) * m


def _policy_kernel(x_ref, w1_ref, w2_ref, wo_ref, bias_ref, mu_ref,
                   *, h1, h2, ac_dim):
    # Hidden layer 1: ReLU(x @ W1 + b1)
    h = jnp.dot(x_ref[...], w1_ref[...], preferred_element_type=jnp.float32)
    h = jnp.maximum(h + bias_ref[0:1, :h1], 0.0)
    # Hidden layer 2: ReLU(h @ W2 + b2)
    h = jnp.dot(h, w2_ref[...], preferred_element_type=jnp.float32)
    h = jnp.maximum(h + bias_ref[1:2, :h2], 0.0)
    # Output layer (Gaussian mean), unpadded: block last dim == ac_dim.
    mu = jnp.dot(h, wo_ref[...], preferred_element_type=jnp.float32)
    mu_ref[...] = (mu + bias_ref[2:3, :ac_dim]).astype(mu_ref.dtype)


def gaussian_policy_forward(x, params, *, tile_b=4096):
    """MLP policy forward in one pipelined Pallas kernel.

    Returns (mu, std): mu has shape (B, ac_dim), std has shape (ac_dim,).
    """
    w1, b1, w2, b2, wo, bo, log_std = params
    B, ob_dim = x.shape
    h1 = w1.shape[1]
    h2 = w2.shape[1]
    ac_dim = wo.shape[1]

    # --- Pack the three bias rows into a single small VMEM input.
    pack_dim = _round_up(max(h1, h2, ac_dim), 128)
    bias_pack = jnp.zeros((3, pack_dim), jnp.float32)
    bias_pack = bias_pack.at[0, :h1].set(b1)
    bias_pack = bias_pack.at[1, :h2].set(b2)
    bias_pack = bias_pack.at[2, :ac_dim].set(bo)

    # --- Batch tiling: tb multiple of 8; keep >= 2 grid steps when the batch
    # allows so v7x's two TensorCores both get work on the "parallel" axis.
    b8 = _round_up(B, 8)
    tb = _round_up(min(tile_b, b8), 8)
    if b8 // tb < 2 and b8 >= 16:
        tb = _round_up((b8 + 1) // 2, 8)
    b_pad = _round_up(b8, tb)

    if b_pad != B:
        # Only hit when B is not already tile-aligned (e.g. tiny / ragged batch).
        x_in = jnp.pad(x, ((0, b_pad - B), (0, 0)))
    else:
        x_in = x

    grid = (b_pad // tb,)
    kernel = functools.partial(_policy_kernel, h1=h1, h2=h2, ac_dim=ac_dim)

    flops = 2 * b_pad * (ob_dim * h1 + h1 * h2 + h2 * ac_dim)
    bytes_accessed = 4 * (x_in.size + w1.size + w2.size + wo.size
                          + bias_pack.size + b_pad * ac_dim)

    mu_full = pl.pallas_call(
        kernel,
        out_shape=jax.ShapeDtypeStruct((b_pad, ac_dim), jnp.float32),
        grid=grid,
        in_specs=[
            pl.BlockSpec((tb, ob_dim), lambda i: (i, 0)),      # x stream
            pl.BlockSpec((ob_dim, h1), lambda i: (0, 0)),      # W1 (resident)
            pl.BlockSpec((h1, h2), lambda i: (0, 0)),          # W2 (resident)
            pl.BlockSpec((h2, ac_dim), lambda i: (0, 0)),      # Wo (resident, unpadded)
            pl.BlockSpec((3, pack_dim), lambda i: (0, 0)),     # packed biases
        ],
        out_specs=pl.BlockSpec((tb, ac_dim), lambda i: (i, 0)),
        compiler_params=pltpu.CompilerParams(
            dimension_semantics=("parallel",)),
        cost_estimate=pl.CostEstimate(
            flops=flops, transcendentals=0, bytes_accessed=bytes_accessed),
    )(x_in, w1, w2, wo, bias_pack)

    mu = mu_full if b_pad == B else mu_full[:B]
    std = jnp.exp(log_std)  # batch-independent; computed outside the kernel
    return mu, std


def init_params(key, ob_dim, ac_dim, hidden):
    """PyTorch Linear default init: U(-1/sqrt(fan_in), 1/sqrt(fan_in)).
    Weights stored pre-transposed as (in, out)."""
    nodes = [ob_dim] + hidden
    params = []
    keys = jax.random.split(key, 2 * (len(hidden) + 1))
    ki = 0
    for i in range(len(hidden)):
        fan_in = nodes[i]
        bound = 1.0 / jnp.sqrt(fan_in)
        w = jax.random.uniform(keys[ki], (nodes[i], nodes[i + 1]),
                               minval=-bound, maxval=bound, dtype=jnp.float32)
        ki += 1
        b = jax.random.uniform(keys[ki], (nodes[i + 1],),
                               minval=-bound, maxval=bound, dtype=jnp.float32)
        ki += 1
        params += [w, b]
    fan_in = nodes[-1]
    bound = 1.0 / jnp.sqrt(fan_in)
    wo = jax.random.uniform(keys[ki], (nodes[-1], ac_dim),
                            minval=-bound, maxval=bound, dtype=jnp.float32)
    ki += 1
    bo = jax.random.uniform(keys[ki], (ac_dim,),
                            minval=-bound, maxval=bound, dtype=jnp.float32)
    log_std = jnp.full((ac_dim,), -0.5, dtype=jnp.float32)
    return tuple(params) + (wo, bo, log_std)


def reference_forward(x, params):
    w1, b1, w2, b2, wo, bo, log_std = params
    h = jnp.maximum(x @ w1 + b1, 0.0)
    h = jnp.maximum(h @ w2 + b2, 0.0)
    mu = h @ wo + bo
    return mu, jnp.exp(log_std)


if __name__ == "__main__":
    key = jax.random.PRNGKey(0)
    k_param, k_x, k_x2 = jax.random.split(key, 3)

    ob_dim, ac_dim, hidden = 16, 8, [32, 32]
    batch = 20  # deliberately not a multiple of 8 to exercise padding

    params = init_params(k_param, ob_dim, ac_dim, hidden)
    x = jax.random.normal(k_x, (batch, ob_dim), dtype=jnp.float32)

    mu_ref, std_ref = reference_forward(x, params)

    # Default tiling (splits into 2 "parallel" steps for the 2-TC case).
    mu, std = gaussian_policy_forward(x, params)
    mu = jax.block_until_ready(mu)
    std = jax.block_until_ready(std)
    assert mu.shape == (batch, ac_dim)
    assert jnp.allclose(mu, mu_ref, atol=1e-5, rtol=1e-5), "mu mismatch"
    assert jnp.allclose(std, std_ref, atol=1e-6, rtol=1e-6), "std mismatch"

    # Small tile to exercise a longer pipelined batch grid.
    mu2, std2 = gaussian_policy_forward(x, params, tile_b=8)
    mu2 = jax.block_until_ready(mu2)
    assert jnp.allclose(mu2, mu_ref, atol=1e-5, rtol=1e-5), "mu mismatch (tiled)"
    assert jnp.allclose(std2, std_ref, atol=1e-6, rtol=1e-6), "std mismatch (tiled)"

    # Tile-aligned batch: exercises the zero-copy wrapper path (no pad, no slice).
    x_big = jax.random.normal(k_x2, (64, ob_dim), dtype=jnp.float32)
    mu_big_ref, _ = reference_forward(x_big, params)
    mu_big, _ = gaussian_policy_forward(x_big, params)
    mu_big = jax.block_until_ready(mu_big)
    assert mu_big.shape == (64, ac_dim)
    assert jnp.allclose(mu_big, mu_big_ref, atol=1e-5, rtol=1e-5), "mu mismatch (aligned)"

    print("KERNEL_OK")
</pallas_src>

<mosaic_0001>
module attributes {stable_mosaic.version = 11 : i64} {
  func.func @_policy_kernel(%arg0: i32, %arg1: memref<16x16xf32, #tpu.memory_space<vmem>>, %arg2: memref<16x32xf32, #tpu.memory_space<vmem>>, %arg3: memref<32x32xf32, #tpu.memory_space<vmem>>, %arg4: memref<32x8xf32, #tpu.memory_space<vmem>>, %arg5: memref<3x128xf32, #tpu.memory_space<vmem>>, %arg6: memref<16x8xf32, #tpu.memory_space<vmem>>) attributes {dimension_semantics = [#tpu.dimension_semantics<parallel>], iteration_bounds = array<i64: 2>, scalar_prefetch = 0 : i64, scratch_operands = 0 : i64, tpu.core_type = #tpu.core_type<tc>, window_params = [{transform_indices = @transform_0, window_bounds = array<i64: 16, 16>}, {pipeline_mode = #tpu.pipeline_mode<synchronous>, transform_indices = @transform_1, window_bounds = array<i64: 16, 32>}, {pipeline_mode = #tpu.pipeline_mode<synchronous>, transform_indices = @transform_2, window_bounds = array<i64: 32, 32>}, {pipeline_mode = #tpu.pipeline_mode<synchronous>, transform_indices = @transform_3, window_bounds = array<i64: 32, 8>}, {pipeline_mode = #tpu.pipeline_mode<synchronous>, transform_indices = @transform_4, window_bounds = array<i64: 3, 128>}, {transform_indices = @transform_5, window_bounds = array<i64: 16, 8>}]} {
    %c0 = arith.constant 0 : index
    %c0_0 = arith.constant 0 : index
    %0 = vector.load %arg1[%c0, %c0_0] : memref<16x16xf32, #tpu.memory_space<vmem>>, vector<16x16xf32>
    %c0_1 = arith.constant 0 : index
    %c0_2 = arith.constant 0 : index
    %1 = vector.load %arg2[%c0_1, %c0_2] : memref<16x32xf32, #tpu.memory_space<vmem>>, vector<16x32xf32>
    %cst = arith.constant dense<0.000000e+00> : vector<16x32xf32>
    %2 = tpu.matmul %0, %1, %cst {dimension_numbers = #tpu.dot_dimension_numbers<[1], [0], [0], [1], [0, 0, 1, 1], [], []>} : vector<16x16xf32>, vector<16x32xf32>, vector<16x32xf32> -> vector<16x32xf32>
    %c0_3 = arith.constant 0 : index
    %c0_4 = arith.constant 0 : index
    %3 = vector.load %arg5[%c0_3, %c0_4] : memref<3x128xf32, #tpu.memory_space<vmem>>, vector<1x32xf32>
    %4 = vector.broadcast %3 : vector<1x32xf32> to vector<16x32xf32>
    %5 = arith.addf %2, %4 : vector<16x32xf32>
    %cst_5 = arith.constant 0.000000e+00 : f32
    %6 = vector.broadcast %cst_5 : f32 to vector<16x32xf32>
    %7 = arith.maximumf %5, %6 : vector<16x32xf32>
    %c0_6 = arith.constant 0 : index
    %c0_7 = arith.constant 0 : index
    %8 = vector.load %arg3[%c0_6, %c0_7] : memref<32x32xf32, #tpu.memory_space<vmem>>, vector<32x32xf32>
    %cst_8 = arith.constant dense<0.000000e+00> : vector<16x32xf32>
    %9 = tpu.matmul %7, %8, %cst_8 {dimension_numbers = #tpu.dot_dimension_numbers<[1], [0], [0], [1], [0, 0, 1, 1], [], []>} : vector<16x32xf32>, vector<32x32xf32>, vector<16x32xf32> -> vector<16x32xf32>
    %c1 = arith.constant 1 : index
    %c0_9 = arith.constant 0 : index
    %10 = vector.load %arg5[%c1, %c0_9] : memref<3x128xf32, #tpu.memory_space<vmem>>, vector<1x32xf32>
    %11 = vector.broadcast %10 : vector<1x32xf32> to vector<16x32xf32>
    %12 = arith.addf %9, %11 : vector<16x32xf32>
    %cst_10 = arith.constant 0.000000e+00 : f32
    %13 = vector.broadcast %cst_10 : f32 to vector<16x32xf32>
    %14 = arith.maximumf %12, %13 : vector<16x32xf32>
    %c0_11 = arith.constant 0 : index
    %c0_12 = arith.constant 0 : index
    %15 = vector.load %arg4[%c0_11, %c0_12] : memref<32x8xf32, #tpu.memory_space<vmem>>, vector<32x8xf32>
    %cst_13 = arith.constant dense<0.000000e+00> : vector<16x8xf32>
    %16 = tpu.matmul %14, %15, %cst_13 {dimension_numbers = #tpu.dot_dimension_numbers<[1], [0], [0], [1], [0, 0, 1, 1], [], []>} : vector<16x32xf32>, vector<32x8xf32>, vector<16x8xf32> -> vector<16x8xf32>
    %c2 = arith.constant 2 : index
    %c0_14 = arith.constant 0 : index
    %17 = vector.load %arg5[%c2, %c0_14] : memref<3x128xf32, #tpu.memory_space<vmem>>, vector<1x8xf32>
    %18 = vector.broadcast %17 : vector<1x8xf32> to vector<16x8xf32>
    %19 = arith.addf %16, %18 : vector<16x8xf32>
    %c0_15 = arith.constant 0 : index
    %c0_16 = arith.constant 0 : index
    %20 = vector.load %arg6[%c0_15, %c0_16] : memref<16x8xf32, #tpu.memory_space<vmem>>, vector<16x8xf32>
    tpu.vector_store %arg6[%c0_15, %c0_16], %19 {strides = array<i32>} : memref<16x8xf32, #tpu.memory_space<vmem>>, vector<16x8xf32>,
    return
  }
  func.func @transform_0(%arg0: i32) -> (i32, i32) {
    %c0_i32 = arith.constant 0 : i32
    %c0_i32_0 = arith.constant 0 : i32
    return %arg0, %c0_i32 : i32, i32
  }
  func.func @transform_1(%arg0: i32) -> (i32, i32) {
    %c0_i32 = arith.constant 0 : i32
    %c0_i32_0 = arith.constant 0 : i32
    %c0_i32_1 = arith.constant 0 : i32
    return %c0_i32, %c0_i32_0 : i32, i32
  }
  func.func @transform_2(%arg0: i32) -> (i32, i32) {
    %c0_i32 = arith.constant 0 : i32
    %c0_i32_0 = arith.constant 0 : i32
    %c0_i32_1 = arith.constant 0 : i32
    return %c0_i32, %c0_i32_0 : i32, i32
  }
  func.func @transform_3(%arg0: i32) -> (i32, i32) {
    %c0_i32 = arith.constant 0 : i32
    %c0_i32_0 = arith.constant 0 : i32
    %c0_i32_1 = arith.constant 0 : i32
    return %c0_i32, %c0_i32_0 : i32, i32
  }
  func.func @transform_4(%arg0: i32) -> (i32, i32) {
    %c0_i32 = arith.constant 0 : i32
    %c0_i32_0 = arith.constant 0 : i32
    %c0_i32_1 = arith.constant 0 : i32
    return %c0_i32, %c0_i32_0 : i32, i32
  }
  func.func @transform_5(%arg0: i32) -> (i32, i32) {
    %c0_i32 = arith.constant 0 : i32
    %c0_i32_0 = arith.constant 0 : i32
    return %arg0, %c0_i32 : i32, i32
  }
}

</mosaic_0001>

<bundles_post_ra>
// kernel: tpu_custom_call.1
= control target key start
LH: loop header
LB: loop body
LE: loop exit
PB: predicated region body
PF: predicated region fallthrough
CT: control target
= control target key end

     0   :  { %s694_s18 = smov 0   ;;  %s761_s0 = inlined_call_operand.vmem [shape: f32[32,16], index: 0, kind: input, shape index: {}]   ;;  %s762_s1 = inlined_call_operand.vmem [shape: f32[16,32], index: 1, kind: input, shape index: {}]   ;;  %s763_s2 = inlined_call_operand.vmem [shape: f32[32,32], index: 2, kind: input, shape index: {}]   ;;  %s764_s3 = inlined_call_operand.vmem [shape: f32[32,8], index: 3, kind: input, shape index: {}]   ;;  %s765_s4 = inlined_call_operand.vmem [shape: f32[3,128], index: 4, kind: input, shape index: {}]   ;;  %s766_s5 = inlined_call_operand.vmem [shape: f32[32,8], index: 5, kind: output, shape index: {}]  }
   0x1 LB: > { %s563_s19 = sadd.s32 4294967295, %s662_s18   ;;  %p567_p0 = scmp.ge.s32.totalorder %s662_s18, 1  ;;  %s662_s18 = sphi %s694_s18, %s15_s18  }
   0x2   : > { %p188_p1 = scmp.lt.s32.totalorder %s662_s18, 3 }
   0x4   : > { %p189_p2 = pnand %p567_p0, %p188_p1 }
   0x5   : > { %v230_v0 = vld [vmem:[%s762_s1] sm:$0xff] (!%p189_p2)  ;;  %v231_v1 = vld [vmem:[%s762_s1 + $0x8] sm:$0xff] (!%p189_p2)  ;;  %s568_s24 = sshll.u32 (!%p189_p2), %s563_s19, 1  ;;  %vm237_vm0 = vcmask (!%p189_p2), 130048   ;;  %v323_v8 = vld [vmem:[%s763_s2 + $0x10] sm:$0xff] (!%p189_p2)  ;;  %vm330_vm1 = vcmask (!%p189_p2), 261120  }
   0x6   : > { %192 = sbr.rel (%p189_p2) target bundleno = 670 (0x29e), region = 40  ;;  %v321_v2 = vld [vmem:[%s763_s2] sm:$0xff] (!%p189_p2)  ;;  %v628_v3 = vpack.c.bf16 (!%p189_p2), %v231_v1, %v230_v0  ;;  %p217_p3 = scmp.lt.s32.totalorder (!%p189_p2), %s568_s24, 3  ;;  %v322_v4 = vld [vmem:[%s763_s2 + $0x8] sm:$0xff] (!%p189_p2)  ;;  %v324_v9 = vld [vmem:[%s763_s2 + $0x18] sm:$0xff] (!%p189_p2)  ;;  %vm504_vm2 = vcmask (!%p189_p2), 64512  }
   0x7   : > { %v632_v5 = vpack.c.bf16 (!%p189_p2), %v322_v4, %v321_v2  ;;  %v636_v10 = vpack.c.bf16 (!%p189_p2), %v324_v9, %v323_v8  ;;  %v414_v11 = vld [vmem:[%s764_s3] sm:$0xff] (!%p189_p2)  ;;  %v415_v12 = vld [vmem:[%s764_s3 + $0x8] sm:$0xff] (!%p189_p2)  ;;  %v416_v21 = vld [vmem:[%s764_s3 + $0x10] sm:$0xff] (!%p189_p2) }
   0x8   : > { %629 = vmatprep.subr.bf16.mxu0 (!%p189_p2), %v628_v3  ;;  %v640_v13 = vpack.c.bf16 (!%p189_p2), %v415_v12, %v414_v11  ;;  %v572_v14 = vld [vmem:[%s765_s4] ss:$0 sm:$0xff] (!%p189_p2)  ;;  %v417_v22 = vld [vmem:[%s764_s3 + $0x18] sm:$0xff] (!%p189_p2)  ;;  %v575_v24 = vld [vmem:[%s765_s4 + $0x1] ss:$0 sm:$0xff] (!%p189_p2) }
   0x9   : > { %631 = vmatpush3.bf16.msra.mxu0 (!%p189_p2), %v628_v3  ;;  %633 = vmatprep.subr.bf16.mxu1 (!%p189_p2), %v632_v5  ;;  %v644_v23 = vpack.c.bf16 (!%p189_p2), %v417_v22, %v416_v21  ;;  %v578_v31 = vld [vmem:[%s765_s4 + $0x2] ss:$0 sm:$0xff] (!%p189_p2) }
   0xa   : > { %635 = vmatpush3.bf16.msra.mxu1 (!%p189_p2), %v632_v5  ;;  %641 = vmatprep.subr.bf16.mxu0 (!%p189_p2), %v640_v13 }
   0xb   : > { %637 = vmatprep.subr.bf16.mxu1 (!%p189_p2), %v636_v10 }
   0xd   : > { %s768_s24 = smov (!%p217_p3, %s568_s24), 3 }
   0xe   : > { %s569_s29 = sshll.u32 %s768_s24, 3  ;;  %639 = vmatpush3.bf16.msra.mxu1 %v636_v10 }
   0xf   : > { %s220_s7 = scalar_lea.vmem %s761_s0, %s569_s29  ;;  %s226_s6 = scalar_lea.vmem %s766_s5, %s569_s29 }
  0x10   : > { %v228_v6 = vld [vmem:[%s220_s7] sm:$0xff]  ;;  %v229_v7 = vld [vmem:[%s220_s7 + $0x8] sm:$0xff] }
  0x11   : > { %603 = vmatprep.mubr.msk.f32.mxu0 %vm237_vm0, %v228_v6 }
  0x12   : > { %604 = vmatmul.mubr.msk.f32.vlgmr.msra.gmra.mrb[0].mxu0 %vm237_vm0, %v229_v7 }
  0x13   : > { %643 = vmatpush3.bf16.msra.mxu0 %v640_v13 }
  0x14   : > { %645 = vmatprep.subr.bf16.mxu0 %v644_v23 }
  0x17   : > { %647 = vmatpush3.bf16.msra.mxu0 %v644_v23 }
  0xe5   : > { %v605_v15 = vpop.f32.mrb[0].mxu0 }
  0xe6   : > { %v316_v16 = vadd.f32 %v605_v15, %v572_v14  ;;  %v310_v17 = vpop.f32.mrb[1].mxu0 }
  0xe7   : > { %v311_v18 = vadd.f32 %v572_v14, %v310_v17 }
  0xe8   : > { %v320_v20 = vmax.f32 %v316_v16, 0.0 }
  0xe9   : > { %v319_v19 = vmax.f32 %v311_v18, 0.0 }
  0xeb   : > { %614 = vmatprep.mubr.msk.f32.mxu1 %vm330_vm1, %v319_v19 }
  0xec   : > { %615 = vmatmul.mubr.msk.f32.vlgmr.msra.gmra.mrb[0].mxu1 %vm330_vm1, %v320_v20 }
 0x1bf   : > { %v616_v25 = vpop.f32.mrb[0].mxu1 }
 0x1c0   : > { %v409_v26 = vadd.f32 %v616_v25, %v575_v24  ;;  %v403_v27 = vpop.f32.mrb[1].mxu1 }
 0x1c1   : > { %v404_v28 = vadd.f32 %v575_v24, %v403_v27 }
 0x1c2   : > { %v413_v30 = vmax.f32 %v409_v26, 0.0 }
 0x1c3   : > { %v412_v29 = vmax.f32 %v404_v28, 0.0 }
 0x1c5   : > { %625 = vmatprep.mubr.msk.f32.mxu0 %vm330_vm1, %v412_v29 }
 0x1c6   : > { %626 = vmatmul.mubr.msk.f32.vlgmr.msra.gmra.mrb[2].mxu0 %vm330_vm1, %v413_v30 }
 0x299   : > { %v627_v32 = vpop.f32.mrb[2].mxu0 }
 0x29a   : > { %v495_v33 = vpop.f32.mrb[3].mxu0  ;;  %v501_v35 = vadd.f32 %v627_v32, %v578_v31 }
 0x29b   : > { %v496_v34 = vadd.f32 %v578_v31, %v495_v33 }
 0x29c   : > { %506 = vst.msk [vmem:[%s226_s6 + $0x8] sm:$0xff] %vm504_vm2, %v501_v35 }
 0x29d   : > { %505 = vst.msk [vmem:[%s226_s6] sm:$0xff] %vm504_vm2, %v496_v34 }
 0x29e PF: > { %s15_s18 = sadd.s32 1, %s662_s18  }
 0x29f   : > { %p12_p4 = scmp.ge.s32.totalorder %s15_s18, 4  }
 0x2a1   :  { %14 = sbr.rel (!%p12_p4) target bundleno = 1 (0x1), region = 70 }

</bundles_post_ra>
